<compile_context>
chip_gen: v5e
topology: v5e:2x2
jax: 0.10.0
libtpu: 0.0.40
codegen_flags: <defaults>
</compile_context>

<pallas_src>
import jax
import jax.numpy as jnp
from jax.experimental import pallas as pl
from jax.experimental.pallas import tpu as pltpu


LANE = 128
_BLOCK_BYTES = 4 * 1024 * 1024          # ~4 MiB per pipeline buffer
_SMALL_LIMIT_BYTES = 512 * 1024         # gridless single-block threshold


def _cube_kernel(x_ref, o_ref):
    x = x_ref[...]
    o_ref[...] = x * x * x  # x ** 3, two VPU muls per element


def _sublane_multiple(dtype):
    """Native sublane packing multiple: 8 for 4-byte, 16 for 2-byte, 32 for 1-byte."""
    itemsize = jnp.dtype(dtype).itemsize
    return max(8, 32 // itemsize)


def _cube_2d(x2d):
    """Cube a lane-dense (rows, 128) slab with a Pallas TPU kernel."""
    rows, lane = x2d.shape
    dtype = x2d.dtype
    itemsize = jnp.dtype(dtype).itemsize
    n = rows * lane
    total_bytes = n * itemsize
    ce = pl.CostEstimate(
        flops=2 * n, transcendentals=0, bytes_accessed=2 * total_bytes
    )

    # Small-input fast path: one full-array block, no grid.  Full-array block
    # shape is always layout-legal; usage is far under the scoped-VMEM default.
    if total_bytes <= _SMALL_LIMIT_BYTES:
        return pl.pallas_call(
            _cube_kernel,
            out_shape=jax.ShapeDtypeStruct((rows, lane), dtype),
            cost_estimate=ce,
        )(x2d)

    # Tiled path: byte-budgeted blocks, ragged last block handled by Pallas,
    # grid axis parallel (v7x shards it across both TensorCores).
    sub = _sublane_multiple(dtype)
    budget_rows = _BLOCK_BYTES // (lane * itemsize)
    budget_rows -= budget_rows % sub
    # Guarantee >= 2 grid steps so the pipeline overlaps input/output DMA and
    # the parallel axis actually splits on v7x.
    half_rows = -(-rows // 2)                 # ceil(rows / 2)
    half_rows = -(-half_rows // sub) * sub    # round up to sublane multiple
    tile_rows = max(sub, min(budget_rows, half_rows))
    grid = (pl.cdiv(rows, tile_rows),)

    block_bytes = tile_rows * lane * itemsize
    # in + out, each double-buffered, plus headroom.  Explicit so v5e's 16 MiB
    # scoped default never bites; well under physical VMEM on all generations.
    vmem_limit = 4 * block_bytes + (4 << 20)

    # TODO(synk): input_output_aliases={0: 0} would let XLA reuse the input
    # buffer for the output (peak-HBM-footprint win) but requires the caller
    # to donate x; left off to keep eager/non-donated calls safe.
    return pl.pallas_call(
        _cube_kernel,
        out_shape=jax.ShapeDtypeStruct((rows, lane), dtype),
        grid=grid,
        in_specs=[pl.BlockSpec((tile_rows, lane), lambda i: (i, 0))],
        out_specs=pl.BlockSpec((tile_rows, lane), lambda i: (i, 0)),
        compiler_params=pltpu.CompilerParams(
            dimension_semantics=("parallel",),
            vmem_limit_bytes=vmem_limit,
        ),
        cost_estimate=ce,
    )(x2d)


def warp_forward(x):
    """Elementwise cube computed in a Pallas TPU kernel.

    Any shape/dtype.  Computation happens at the input dtype (matches the
    PyTorch reference; integer inputs wrap exactly like torch's x ** 3).
    """
    orig_shape = x.shape
    dtype = x.dtype
    n = x.size
    if n == 0:
        return x

    xf = x.reshape(-1)
    rem = n % LANE

    if rem == 0:
        # Common path: zero wrapper-side copies — metadata reshapes only.
        out2d = _cube_2d(xf.reshape(n // LANE, LANE))
        return out2d.reshape(orig_shape)

    # Rare awkward-size path: kernel handles the lane-aligned prefix; only the
    # (< 128-element) tail gets a tiny padded single-block call.
    # TODO(synk): a masked pltpu.store in the last grid step would also avoid
    # the final concatenate copy on very large non-divisible inputs.
    main = n - rem
    parts = []
    if main > 0:
        parts.append(_cube_2d(xf[:main].reshape(main // LANE, LANE)).reshape(-1))
    tail = xf[main:]
    tail_padded = jnp.zeros((LANE,), dtype=dtype).at[:rem].set(tail)
    parts.append(_cube_2d(tail_padded.reshape(1, LANE)).reshape(-1)[:rem])
    out = parts[0] if len(parts) == 1 else jnp.concatenate(parts)
    return out.reshape(orig_shape)


class WarpPallas:
    """JAX/Pallas port of the PyTorch `Warp` module."""

    def __init__(self, d, key=None):
        if key is None:
            key = jax.random.PRNGKey(42)
        # Deterministic stand-in for np.random.normal(size=(d, d)); unused in
        # forward (matches the PyTorch module, where U is never applied).
        self.U = jax.random.normal(key, (d, d), dtype=jnp.float32)

    def inverse(self, x):
        # out = |x|**(1/3) * sign(x)  (plain JAX glue; not the hot path)
        return jnp.abs(x) ** (1.0 / 3.0) * jnp.sign(x)

    def forward(self, x):
        return warp_forward(x)

    def __call__(self, x):
        return self.forward(x)


if __name__ == "__main__":
    key = jax.random.PRNGKey(0)
    # NCHW input, small shapes: batch=2, channels=4, spatial=16x16
    x = jax.random.normal(key, (2, 4, 16, 16), dtype=jnp.float32)

    d = 16
    model = WarpPallas(d)

    out = jax.block_until_ready(model(x))

    # Correctness check against plain JAX reference (small / gridless path).
    ref = x ** 3
    assert out.shape == x.shape and out.dtype == x.dtype
    assert jnp.allclose(out, ref, atol=1e-6, rtol=1e-6)

    # Round-trip sanity: inverse(forward(x)) ~ x
    rt = model.inverse(out)
    assert jnp.allclose(rt, x, atol=1e-3, rtol=1e-3)

    # Tiled path, 16 MiB f32 -> 4 grid steps of ~4 MiB blocks (even count,
    # good for v7x's two TensorCores).
    xb = jax.random.normal(jax.random.PRNGKey(1), (8, 16, 128, 256),
                           dtype=jnp.float32)
    outb = jax.block_until_ready(warp_forward(xb))
    assert jnp.allclose(outb, xb ** 3, atol=1e-5, rtol=1e-5)

    # Mid-size (2 MiB f32): above the small threshold, should take the
    # pipelined path with exactly 2 grid steps.
    xm = jax.random.normal(jax.random.PRNGKey(3), (4, 4, 128, 256),
                           dtype=jnp.float32)
    outm = jax.block_until_ready(warp_forward(xm))
    assert jnp.allclose(outm, xm ** 3, atol=1e-5, rtol=1e-5)

    # Awkward element counts: prefix+tail split (no whole-array pad/slice).
    xs = jax.random.normal(jax.random.PRNGKey(2), (3, 5, 7), dtype=jnp.float32)
    outs = jax.block_until_ready(warp_forward(xs))
    assert jnp.allclose(outs, xs ** 3, atol=1e-6, rtol=1e-6)

    xa = jax.random.normal(jax.random.PRNGKey(4), (1000, 13), dtype=jnp.float32)
    outa = jax.block_until_ready(warp_forward(xa))
    assert jnp.allclose(outa, xa ** 3, atol=1e-6, rtol=1e-6)

    print("KERNEL_OK")
</pallas_src>

<mosaic_0001>
module attributes {stable_mosaic.version = 11 : i64} {
  func.func @_cube_kernel(%arg0: memref<16x128xf32, #tpu.memory_space<vmem>>, %arg1: memref<16x128xf32, #tpu.memory_space<vmem>>) attributes {dimension_semantics = [], scalar_prefetch = 0 : i64, scratch_operands = 0 : i64, tpu.core_type = #tpu.core_type<tc>} {
    %c0 = arith.constant 0 : index
    %c0_0 = arith.constant 0 : index
    %0 = vector.load %arg0[%c0, %c0_0] : memref<16x128xf32, #tpu.memory_space<vmem>>, vector<16x128xf32>
    %1 = arith.mulf %0, %0 : vector<16x128xf32>
    %2 = arith.mulf %1, %0 : vector<16x128xf32>
    %c0_1 = arith.constant 0 : index
    %c0_2 = arith.constant 0 : index
    %3 = vector.load %arg1[%c0_1, %c0_2] : memref<16x128xf32, #tpu.memory_space<vmem>>, vector<16x128xf32>
    tpu.vector_store %arg1[%c0_1, %c0_2], %2 {strides = array<i32>} : memref<16x128xf32, #tpu.memory_space<vmem>>, vector<16x128xf32>,
    return
  }
}

</mosaic_0001>

<bundles_post_ra>
// kernel: tpu_custom_call.1
= control target key start
LH: loop header
LB: loop body
LE: loop exit
PB: predicated region body
PF: predicated region fallthrough
CT: control target
= control target key end

     0   :  { %6 = vsyncpa [#allocation3], 0  ;;  %s128_s0 = inlined_call_operand.hbm [shape: f32[16,128], index: 0, kind: input, shape index: {}]   ;;  %s129_s1 = inlined_call_operand.hbm [shape: f32[16,128], index: 1, kind: output, shape index: {}]  }
   0x1   :  { %7 = vsyncpa [#allocation4], 0  ;;  %s12_s8 = sshll.u32 %s128_s0, 4  ;;  %s108_s9 = smov [#allocation2]   ;;  %s13_s8 = int_to_ptr.hbm [resolvable:$true] %s12_s8 }
   0x2   :  { %s14_s10 = sshll.u32 %s108_s9, 4  ;;  %s109_s11 = smov 128   ;;  %s15_s10 = int_to_ptr.vmem [resolvable:$true] %s14_s10 }
   0x3   :  { %s110_s12 = smov 8  }
   0x4   :  { %20 = dma.hbm_to_vmem [thread:$0]  %s13_s8, 256, %s15_s10, [#allocation3], %s109_s11, %s109_s11, %s110_s12  }
   0x5   :  { %104 = dma.done.wait [#allocation3], 256  }
   0x6   :  { %105 = vsyncadd [#allocation3], 4294967040  ;;  %v25_v0 = vld [vmem:[#allocation2] sm:$0xff]  ;;  %v26_v1 = vld [vmem:[#allocation2 + $0x8] sm:$0xff]  ;;  %s111_s13 = smov [#allocation5]   ;;  %s39_s17 = sshll.u32 %s129_s1, 4  ;;  %s40_s17 = int_to_ptr.hbm [resolvable:$true] %s39_s17 }
   0x7   :  { %v27_v2 = vmul.f32 %v25_v0, %v25_v0  ;;  %v28_v3 = vmul.f32 %v26_v1, %v26_v1  ;;  %s37_s14 = sshll.u32 %s111_s13, 4  ;;  %s38_s14 = int_to_ptr.vmem [resolvable:$true] %s37_s14 }
   0x9   :  { %v29_v4 = vmul.f32 %v27_v2, %v25_v0  ;;  %v30_v5 = vmul.f32 %v28_v3, %v26_v1 }
   0xb   :  { %31 = vst [vmem:[#allocation5] sm:$0xff] %v29_v4 }
   0xc   :  { %32 = vst [vmem:[#allocation5 + $0x8] sm:$0xff] %v30_v5 }
   0xd   :  { %45 = dma.vmem_to_hbm [thread:$0]  %s38_s14, 256, %s40_s17, [#allocation4], %s109_s11, %s109_s11, %s110_s12  }
   0xe   :  { %106 = dma.done.wait [#allocation4], 256  }
   0xf   :  { %107 = vsyncadd [#allocation4], 4294967040 }
  0x10   :  { %50 = vsyncpa [#allocation3], 1 }
  0x11   :  { %51 = vsyncpa [#allocation4], 1 }

</bundles_post_ra>
